<compile_context>
chip_gen: v7x
topology: tpu7x:2x2x1
jax: 0.10.0
libtpu: 0.0.40
codegen_flags: <defaults>
</compile_context>

<pallas_src>
import jax
import jax.numpy as jnp
from jax import lax
from jax.experimental import pallas as pl
from jax.experimental.pallas import tpu as pltpu


def mann_forward_kernel(x_ref, wcg_ref, wr_ref, mem_ref, slab_ref, packed_ref):
    C, L = wr_ref.shape
    N = mem_ref.shape[0]
    B = x_ref.shape[0]
    P = packed_ref.shape[1]

    # --- unpack the small-parameter slab with static lane slices (one DMA, one vreg) ---
    slab = slab_ref[...]                                                # (1, Ps)
    o = 0
    bcg = slab[:, o:o + C + 1]; o += C + 1                              # (1, C+1)
    br = slab[:, o:o + L]; o += L                                       # (1, L)
    inv_mnorm = slab[:, o:o + N]; o += N                                # (1, N)
    woh = slab[:, o:o + C]; o += C                                      # (1, C)
    wor = slab[:, o:o + L]; o += L                                      # (1, L)
    bo = slab[:, o:o + 1]                                               # (1, 1)

    x = x_ref[...]                                                      # (B, I)

    # --- Controller: single fused matmul producing [h | gate] ---
    hg = jnp.dot(x, wcg_ref[...],
                 preferred_element_type=jnp.float32) + bcg              # (B, C+1)
    h = jnp.tanh(hg[:, :C])                                             # (B, C)
    gate = hg[:, C:C + 1]                                               # (B, 1) pre-sigmoid

    # --- Head (read key) ---
    key = jnp.dot(h, wr_ref[...],
                  preferred_element_type=jnp.float32) + br              # (B, L)

    # --- Memory.query_read_weight: cosine similarity -> softmax -> read ---
    mem = mem_ref[...]                                                  # (N, L)
    # key . mem^T without materializing a transpose: contract on axis 1 of both.
    dots = lax.dot_general(key, mem, (((1,), (1,)), ((), ())),
                           preferred_element_type=jnp.float32)          # (B, N)
    eps2 = jnp.float32(1e-16)                                           # (1e-8)^2
    k2 = jnp.sum(key * key, axis=-1, keepdims=True)                     # (B, 1)
    inv_knorm = lax.rsqrt(jnp.maximum(k2, eps2))                        # 1/max(||key||, eps)
    sim = dots * inv_knorm * inv_mnorm                                  # (B, N)

    sim_max = jnp.max(sim, axis=-1, keepdims=True)
    e = jnp.exp(sim - sim_max)
    w_read = e * pl.reciprocal(jnp.sum(e, axis=-1, keepdims=True),
                               approx=False)                            # exact softmax
    r = jnp.dot(w_read, mem, preferred_element_type=jnp.float32)        # (B, L)

    # --- out_net (output_dim == 1): split-weight multiply + lane reduce, no concat ---
    out = (jnp.sum(h * woh, axis=-1, keepdims=True)
           + jnp.sum(r * wor, axis=-1, keepdims=True)
           + bo)                                                        # (B, 1)

    # --- compose packed row in registers; ONE full-width unmasked store ---
    parts = [out, h, gate, w_read]
    used = 2 + C + N
    if P > used:
        parts.append(jnp.zeros((B, P - used), jnp.float32))
    packed_ref[...] = jnp.concatenate(parts, axis=-1)                   # (B, P)


def prepare_params(params):
    """One-time, per-parameter-set prep (hoisted out of the per-call path).
    Only the inv_mnorm portion of the slab depends on `mem` and would need
    refreshing after update_memory()."""
    C = params["wc"].shape[1]
    N, L = params["mem"].shape
    assert params["wo"].shape == (C + L, 1), "output_dim must be 1 (scalar per sample)"
    eps = jnp.float32(1e-8)

    wcg = jnp.concatenate([params["wc"], params["wg"]], axis=1)         # (I, C+1)
    bcg = jnp.concatenate([params["bc"], params["bg"]], axis=1).reshape(-1)   # (C+1,)
    br = params["br"].reshape(-1)                                       # (L,)
    inv_mnorm = 1.0 / jnp.maximum(
        jnp.sqrt(jnp.sum(params["mem"] * params["mem"], axis=-1)), eps)  # (N,)
    woh = params["wo"][:C, 0]                                           # (C,)
    wor = params["wo"][C:, 0]                                           # (L,)
    bo = params["bo"].reshape(-1)                                       # (1,)

    small = jnp.concatenate([bcg, br, inv_mnorm, woh, wor, bo])
    n_small = (C + 1) + L + N + C + L + 1
    Ps = ((n_small + 127) // 128) * 128                                 # lane-dense width
    slab = jnp.zeros((1, Ps), jnp.float32).at[0, :n_small].set(small)

    return {"wcg": wcg, "wr": params["wr"], "mem": params["mem"], "slab": slab}


@jax.jit
def mann_forward(x, wcg, wr, mem, slab):
    """Batched MANN forward. Returns (output[B], h[C], gate[], w_read[N])."""
    B = x.shape[0]
    C, L = wr.shape
    N = mem.shape[0]
    P = ((2 + C + N + 127) // 128) * 128                                # packed output width

    vmem_spec = pl.BlockSpec(memory_space=pltpu.MemorySpace.VMEM)
    packed = pl.pallas_call(
        mann_forward_kernel,
        out_shape=jax.ShapeDtypeStruct((B, P), jnp.float32),
        in_specs=[vmem_spec] * 5,
        out_specs=vmem_spec,
    )(x, wcg, wr, mem, slab)

    # Match the torch forward's return: last sample's h / gate / w_read.
    output = packed[:, 0]
    h_last = packed[-1, 1:1 + C]
    gate_last = packed[-1, 1 + C]
    w_read_last = packed[-1, 2 + C:2 + C + N]
    return output, h_last, gate_last, w_read_last
    # TODO(synk): update_memory / compute_least_use mutate module state (prev_read,
    # prev_lu, in-place masked writes) and are not part of forward; not implemented.
    # TODO(synk): when this forward runs per timestep of a sequence, add a grid axis
    # over steps with constant index_maps for the weights/mem (resident in VMEM) so
    # per-call dispatch + operand DMAs are amortized across the whole sequence.
    # TODO(synk): if B / memory dims grow beyond toy sizes, tile B as a "parallel"
    # grid axis (2-TC sharding on v7x, size blocks against its 64 MiB VMEM) and cast
    # matmul operands to bf16 while keeping f32 accumulation (v6e/v7x MXU paths).


if __name__ == "__main__":
    B, input_dim, ctrl_dim = 2, 16, 32
    locations, location_size, output_dim = 8, 16, 1

    key = jax.random.PRNGKey(0)
    ks = jax.random.split(key, 11)
    scale = 0.1
    params = {
        "wc": scale * jax.random.normal(ks[0], (input_dim, ctrl_dim), jnp.float32),
        "bc": scale * jax.random.normal(ks[1], (1, ctrl_dim), jnp.float32),
        "wg": scale * jax.random.normal(ks[2], (input_dim, 1), jnp.float32),
        "bg": scale * jax.random.normal(ks[3], (1, 1), jnp.float32),
        "wr": scale * jax.random.normal(ks[4], (ctrl_dim, location_size), jnp.float32),
        "br": scale * jax.random.normal(ks[5], (1, location_size), jnp.float32),
        "mem": jax.random.normal(ks[6], (locations, location_size), jnp.float32),
        "wo": scale * jax.random.normal(ks[7], (ctrl_dim + location_size, output_dim), jnp.float32),
        "bo": scale * jax.random.normal(ks[8], (1, output_dim), jnp.float32),
    }
    x = jax.random.normal(ks[9], (B, input_dim), jnp.float32)

    prep = prepare_params(params)          # one-time prep, outside the per-call path
    output, h, gate, w_read = mann_forward(x, prep["wcg"], prep["wr"],
                                           prep["mem"], prep["slab"])
    jax.block_until_ready((output, h, gate, w_read))

    assert output.shape == (B,)
    assert h.shape == (ctrl_dim,)
    assert gate.shape == ()
    assert w_read.shape == (locations,)
    # Sanity: softmax weights sum to 1 (exact reciprocal path).
    assert abs(float(jnp.sum(w_read)) - 1.0) < 1e-5
    print("KERNEL_OK")
</pallas_src>

<mosaic_0001>
module attributes {stable_mosaic.version = 11 : i64} {
  func.func @mann_forward_kernel(%arg0: memref<2x16xf32, #tpu.memory_space<vmem>>, %arg1: memref<16x33xf32, #tpu.memory_space<vmem>>, %arg2: memref<32x16xf32, #tpu.memory_space<vmem>>, %arg3: memref<8x16xf32, #tpu.memory_space<vmem>>, %arg4: memref<1x128xf32, #tpu.memory_space<vmem>>, %arg5: memref<2x128xf32, #tpu.memory_space<vmem>>) attributes {dimension_semantics = [], scalar_prefetch = 0 : i64, scratch_operands = 0 : i64, tpu.core_type = #tpu.core_type<tc>} {
    %c0 = arith.constant 0 : index
    %c0_0 = arith.constant 0 : index
    %0 = vector.load %arg4[%c0, %c0_0] : memref<1x128xf32, #tpu.memory_space<vmem>>, vector<1x128xf32>
    %1 = vector.extract_strided_slice %0 {offsets = [0, 0], sizes = [1, 33], strides = [1, 1]} : vector<1x128xf32> to vector<1x33xf32>
    %2 = vector.extract_strided_slice %0 {offsets = [0, 33], sizes = [1, 16], strides = [1, 1]} : vector<1x128xf32> to vector<1x16xf32>
    %3 = vector.extract_strided_slice %0 {offsets = [0, 49], sizes = [1, 8], strides = [1, 1]} : vector<1x128xf32> to vector<1x8xf32>
    %4 = vector.extract_strided_slice %0 {offsets = [0, 57], sizes = [1, 32], strides = [1, 1]} : vector<1x128xf32> to vector<1x32xf32>
    %5 = vector.extract_strided_slice %0 {offsets = [0, 89], sizes = [1, 16], strides = [1, 1]} : vector<1x128xf32> to vector<1x16xf32>
    %6 = vector.extract_strided_slice %0 {offsets = [0, 105], sizes = [1, 1], strides = [1, 1]} : vector<1x128xf32> to vector<1x1xf32>
    %c0_1 = arith.constant 0 : index
    %c0_2 = arith.constant 0 : index
    %7 = vector.load %arg0[%c0_1, %c0_2] : memref<2x16xf32, #tpu.memory_space<vmem>>, vector<2x16xf32>
    %c0_3 = arith.constant 0 : index
    %c0_4 = arith.constant 0 : index
    %8 = vector.load %arg1[%c0_3, %c0_4] : memref<16x33xf32, #tpu.memory_space<vmem>>, vector<16x33xf32>
    %cst = arith.constant dense<0.000000e+00> : vector<2x33xf32>
    %9 = tpu.matmul %7, %8, %cst {dimension_numbers = #tpu.dot_dimension_numbers<[1], [0], [0], [1], [0, 0, 1, 1], [], []>} : vector<2x16xf32>, vector<16x33xf32>, vector<2x33xf32> -> vector<2x33xf32>
    %10 = vector.broadcast %1 : vector<1x33xf32> to vector<2x33xf32>
    %11 = arith.addf %9, %10 : vector<2x33xf32>
    %12 = vector.extract_strided_slice %11 {offsets = [0, 0], sizes = [2, 32], strides = [1, 1]} : vector<2x33xf32> to vector<2x32xf32>
    %13 = math.tanh %12 : vector<2x32xf32>
    %14 = vector.extract_strided_slice %11 {offsets = [0, 32], sizes = [2, 1], strides = [1, 1]} : vector<2x33xf32> to vector<2x1xf32>
    %c0_5 = arith.constant 0 : index
    %c0_6 = arith.constant 0 : index
    %15 = vector.load %arg2[%c0_5, %c0_6] : memref<32x16xf32, #tpu.memory_space<vmem>>, vector<32x16xf32>
    %cst_7 = arith.constant dense<0.000000e+00> : vector<2x16xf32>
    %16 = tpu.matmul %13, %15, %cst_7 {dimension_numbers = #tpu.dot_dimension_numbers<[1], [0], [0], [1], [0, 0, 1, 1], [], []>} : vector<2x32xf32>, vector<32x16xf32>, vector<2x16xf32> -> vector<2x16xf32>
    %17 = vector.broadcast %2 : vector<1x16xf32> to vector<2x16xf32>
    %18 = arith.addf %16, %17 : vector<2x16xf32>
    %c0_8 = arith.constant 0 : index
    %c0_9 = arith.constant 0 : index
    %19 = vector.load %arg3[%c0_8, %c0_9] : memref<8x16xf32, #tpu.memory_space<vmem>>, vector<8x16xf32>
    %cst_10 = arith.constant dense<0.000000e+00> : vector<2x8xf32>
    %20 = tpu.matmul %18, %19, %cst_10 {dimension_numbers = #tpu.dot_dimension_numbers<[1], [1], [0], [0], [0, 0, 1, 0], [], []>} : vector<2x16xf32>, vector<8x16xf32>, vector<2x8xf32> -> vector<2x8xf32>
    %21 = arith.mulf %18, %18 : vector<2x16xf32>
    %cst_11 = arith.constant dense<0.000000e+00> : vector<2xf32>
    %22 = vector.multi_reduction <add>, %21, %cst_11 [1] : vector<2x16xf32> to vector<2xf32>
    %23 = vector.shape_cast %22 : vector<2xf32> to vector<2x1xf32>
    %cst_12 = arith.constant 1.000000e-16 : f32
    %24 = vector.broadcast %cst_12 : f32 to vector<2x1xf32>
    %25 = arith.maximumf %23, %24 : vector<2x1xf32>
    %26 = math.rsqrt %25 : vector<2x1xf32>
    %27 = vector.broadcast %26 : vector<2x1xf32> to vector<2x8xf32>
    %28 = arith.mulf %20, %27 : vector<2x8xf32>
    %29 = vector.broadcast %3 : vector<1x8xf32> to vector<2x8xf32>
    %30 = arith.mulf %28, %29 : vector<2x8xf32>
    %cst_13 = arith.constant dense<0xFF800000> : vector<2xf32>
    %31 = vector.multi_reduction <maximumf>, %30, %cst_13 [1] : vector<2x8xf32> to vector<2xf32>
    %32 = vector.shape_cast %31 : vector<2xf32> to vector<2x1xf32>
    %33 = vector.broadcast %32 : vector<2x1xf32> to vector<2x8xf32>
    %34 = arith.subf %30, %33 : vector<2x8xf32>
    %35 = math.exp %34 : vector<2x8xf32>
    %cst_14 = arith.constant dense<0.000000e+00> : vector<2xf32>
    %36 = vector.multi_reduction <add>, %35, %cst_14 [1] : vector<2x8xf32> to vector<2xf32>
    %37 = vector.shape_cast %36 : vector<2xf32> to vector<2x1xf32>
    %38 = tpu.reciprocal %37 : vector<2x1xf32> -> vector<2x1xf32>
    %39 = vector.broadcast %38 : vector<2x1xf32> to vector<2x8xf32>
    %40 = arith.mulf %35, %39 : vector<2x8xf32>
    %cst_15 = arith.constant dense<0.000000e+00> : vector<2x16xf32>
    %41 = tpu.matmul %40, %19, %cst_15 {dimension_numbers = #tpu.dot_dimension_numbers<[1], [0], [0], [1], [0, 0, 1, 1], [], []>} : vector<2x8xf32>, vector<8x16xf32>, vector<2x16xf32> -> vector<2x16xf32>
    %42 = vector.broadcast %4 : vector<1x32xf32> to vector<2x32xf32>
    %43 = arith.mulf %13, %42 : vector<2x32xf32>
    %cst_16 = arith.constant dense<0.000000e+00> : vector<2xf32>
    %44 = vector.multi_reduction <add>, %43, %cst_16 [1] : vector<2x32xf32> to vector<2xf32>
    %45 = vector.shape_cast %44 : vector<2xf32> to vector<2x1xf32>
    %46 = vector.broadcast %5 : vector<1x16xf32> to vector<2x16xf32>
    %47 = arith.mulf %41, %46 : vector<2x16xf32>
    %cst_17 = arith.constant dense<0.000000e+00> : vector<2xf32>
    %48 = vector.multi_reduction <add>, %47, %cst_17 [1] : vector<2x16xf32> to vector<2xf32>
    %49 = vector.shape_cast %48 : vector<2xf32> to vector<2x1xf32>
    %50 = arith.addf %45, %49 : vector<2x1xf32>
    %51 = vector.broadcast %6 : vector<1x1xf32> to vector<2x1xf32>
    %52 = arith.addf %50, %51 : vector<2x1xf32>
    %cst_18 = arith.constant 0.000000e+00 : f32
    %53 = vector.broadcast %cst_18 : f32 to vector<2x86xf32>
    %54 = tpu.concatenate %52, %13, %14, %40, %53 in 1 : vector<2x1xf32>, vector<2x32xf32>, vector<2x1xf32>, vector<2x8xf32>, vector<2x86xf32> -> vector<2x128xf32>
    %c0_19 = arith.constant 0 : index
    %c0_20 = arith.constant 0 : index
    %55 = vector.load %arg5[%c0_19, %c0_20] : memref<2x128xf32, #tpu.memory_space<vmem>>, vector<2x128xf32>
    tpu.vector_store %arg5[%c0_19, %c0_20], %54 {strides = array<i32>} : memref<2x128xf32, #tpu.memory_space<vmem>>, vector<2x128xf32>,
    return
  }
}

</mosaic_0001>

<bundles_post_ra>
// kernel: mann_forward.1
= control target key start
LH: loop header
LB: loop body
LE: loop exit
PB: predicated region body
PF: predicated region fallthrough
CT: control target
= control target key end

     0   :  { %v478_v0 = vmov 0.0|0.0   ;;  %vm479_vm0 = vmmov 0   ;;  %v480_v3 = vmov 0.0   ;;  %vm30_vm1 = vcmask 130048   ;;  %s481_s7 = smov 95   ;;  %s485_s10 = smov 1   ;;  %s565_s1 = inlined_call_operand.vmem [shape: f32[16,33], index: 1, kind: input, shape index: {}]   ;;  %s566_s0 = inlined_call_operand.vmem [shape: f32[2,16], index: 0, kind: input, shape index: {}]   ;;  %s567_s2 = inlined_call_operand.vmem [shape: f32[32,16], index: 2, kind: input, shape index: {}]   ;;  %s568_s4 = inlined_call_operand.vmem [shape: f32[1,128], index: 4, kind: input, shape index: {}]   ;;  %s569_s3 = inlined_call_operand.vmem [shape: f32[8,16], index: 3, kind: input, shape index: {}]   ;;  %s570_s5 = inlined_call_operand.vmem [shape: f32[2,128], index: 5, kind: output, shape index: {}]  }
   0x1   :  { %451 = vmatprep.subr.bf16.mxu0 %v478_v0  ;;  %v22_v1 = vld [vmem:[%s565_s1] sm:$0xff]  ;;  %v23_v2 = vld [vmem:[%s565_s1 + $0x8] sm:$0xff]  ;;  %427 = vmatprep.mubr.msk.f32.mxu0 %vm479_vm0, %v480_v3  ;;  %v107_v8 = vld [vmem:[%s567_s2 + $0x10] sm:$0xff]  ;;  %vm112_vm2 = vcmask 261120   ;;  %vm264_vm3 = vcmask 123904   ;;  %vm275_vm4 = vcmask 58368  }
   0x2   :  { %v452_v4 = vpack.c.bf16 %v23_v2, %v22_v1  ;;  %454 = vmatprep.subr.bf16.mxu1 %v478_v0  ;;  %438 = vmatprep.mubr.msk.f32.mxu1 %vm479_vm0, %v480_v3  ;;  %v21_v5 = vld [vmem:[%s566_s0] sm:$0x3]  ;;  %v106_v7 = vld [vmem:[%s567_s2 + $0x8] sm:$0xff]  ;;  %v108_v10 = vld [vmem:[%s567_s2 + $0x18] sm:$0xff]  ;;  %vm365_vm5 = vcmask 254976   ;;  %vm287_vm6 = vcmask 64512  }
   0x3   :  { %v105_v6 = vld [vmem:[%s567_s2] sm:$0xff]  ;;  %v458_v11 = vpack.c.bf16 %v108_v10, %v107_v8  ;;  %s482_s2 = smov 79   ;;  %s486_s11 = smov 23   ;;  %vm392_vm7 = vcmask 7168   ;;  %vm394_vm8 = vcmask 269312   ;;  %vm396_vm9 = vcmask 277504  }
   0x4   :  { %453 = vmatpush3.bf16.msra.mxu0 %v452_v4  ;;  %v455_v9 = vpack.c.bf16 %v106_v7, %v105_v6  ;;  %v546_v12 = vld [vmem:[%s568_s4] ss:$0 sm:$0xff]  ;;  %s484_s4 = smov 71   ;;  %s487_s12 = smov 34   ;;  %vm398_vm10 = vcmask 343040  }
   0x5   :  { %441 = vmatprep.subr.mxu0 %v480_v3  ;;  %109 = vrot.lane.b32.xlu0 %v546_v12, %s481_s7  ;;  %v186_v13 = vld [vmem:[%s569_s3] sm:$0xff]  ;;  %s483_s3 = smov 39  }
   0x6   :  { %456 = vmatpush3.bf16.msra.mxu1 %v455_v9  ;;  %271 = vrot.lane.b32.xlu1 %v546_v12, %s482_s2 }
   0x7   :  { %428 = vmatmul.mubr.msk.f32.vlgmr.msra.gmra.mrb[0].mxu0 %vm30_vm1, %v21_v5  ;;  %457 = vmatprep.subr.bf16.mxu1 %v478_v0 }
   0x8   :  { %443 = vmatprep.mubr.msk.f32.mxu0 %vm479_vm0, %v480_v3 }
   0xa   :  { %459 = vmatpush3.bf16.msra.mxu1 %v458_v11 }
   0xd   :  { %442 = vmatpush3.xpose.msk.msra.mxu0 %vm30_vm1, %v186_v13 }
   0xe   :  { %446 = vmatprep.subr.mxu0 %v480_v3 }
  0x77   :  { %v110_v18 = vpop.permute.xlu0 %109 }
  0x78   :  { %v272_v28 = vpop.permute.xlu1 %271 }
  0xda   :  { %v100_v14 = vpop.f32.mrb[0].mxu0 }
  0xdb   :  { %v101_v15 = vadd.f32 %v546_v12, %v100_v14  ;;  %v429_v16 = vpop.f32.mrb[1].mxu0 }
  0xdd   :  { %470 = vtanh.f32 %v101_v15 }
  0xe7   :  { %v471_v17 = vpop.eup %470 }
  0xe8   :  { %439 = vmatmul.mubr.msk.f32.vlgmr.msra.gmra.mrb[0].mxu1 %vm112_vm2, %v471_v17 }
 0x1bb   :  { %v182_v19 = vpop.f32.mrb[0].mxu1 }
 0x1bc   :  { %v183_v20 = vadd.f32 %v182_v19, %v110_v18  ;;  %v440_v21 = vpop.f32.mrb[1].mxu1 }
 0x1be   :  { %444 = vmatmul.mubr.msk.f32.vlgmr.msra.gmra.mrb[2].mxu0 %vm30_vm1, %v183_v20  ;;  %v263_v22 = vmul.f32 %v183_v20, %v183_v20 }
 0x1bf   :  { %447 = vmatpush3.msra.mxu0 %v186_v13  ;;  %448 = vmatprep.mubr.msk.f32.mxu0 %vm479_vm0, %v480_v3 }
 0x1c0   :  { %v265_v23 = vsel %vm264_vm3, %v263_v22, 0.0 }
 0x1c1   :  { %266 = vadd.xlane.f32.xlu0 %v265_v23 }
 0x24e   :  { %v267_v24 = vpop.xlane.xlu0 %266 }
 0x24f   :  { %v268_v25 = vmax.f32 %v267_v24, 1e-16 }
 0x251   :  { %472 = vrsqrt.f32 %v268_v25 }
 0x25b   :  { %v473_v26 = vpop.eup %472 }
 0x291   :  { %v259_v27 = vpop.f32.mrb[2].mxu0 }
 0x292   :  { %v270_v29 = vmul.f32 %v473_v26, %v259_v27  ;;  %v445_v30 = vpop.f32.mrb[3].mxu0 }
 0x294   :  { %v274_v31 = vmul.f32 %v272_v28, %v270_v29 }
 0x296   :  { %v276_v32 = vsel %vm275_vm4, %v274_v31, -inf }
 0x297   :  { %277 = vmax.xlane.f32.xlu1 %v276_v32 }
 0x2a8   :  { %369 = vrot.lane.b32.xlu1 %v546_v12, %s483_s3 }
 0x324   :  { %v278_v33 = vpop.xlane.xlu1 %277 }
 0x325   :  { %v279_v34 = vsub.f32 %v274_v31, %v278_v33 }
 0x327   :  { %v280_v35 = vmul.f32 1.442695, %v279_v34 }
 0x328   :  { %v370_v44 = vpop.permute.xlu1 %369 }
 0x329   :  { %474 = vpow2.f32 %v280_v35 }
 0x333   :  { %v475_v36 = vpop.eup %474 }
 0x334   :  { %v282_v37 = vsel %vm275_vm4, %v475_v36, 0.0 }
 0x335   :  { %283 = vadd.xlane.f32.xlu0 %v282_v37 }
 0x34b   :  { %361 = vrot.lane.b32.xlu0 %v546_v12, %s484_s4 }
 0x3c2   :  { %v284_v38 = vpop.xlane.xlu0 %283 }
 0x3c3   :  { %476 = vrcp.f32 %v284_v38 }
 0x3c6   :  { %v362_v39 = vpop.permute.xlu0 %361 }
 0x3c7   :  { %v364_v40 = vmul.f32 %v471_v17, %v362_v39 }
 0x3c9   :  { %v366_v41 = vsel %vm365_vm5, %v364_v40, 0.0 }
 0x3ca   :  { %367 = vadd.xlane.f32.xlu1 %v366_v41 }
 0x3cd   :  { %v477_v42 = vpop.eup %476 }
 0x3ce   :  { %v286_v43 = vmul.f32 %v477_v42, %v475_v36 }
 0x3d0   :  { %449 = vmatmul.mubr.msk.f32.vlgmr.msra.gmra.mrb[4].mxu0 %vm287_vm6, %v286_v43 }
 0x3db   :  { %382 = vrot.lane.b32.xlu1 %v471_v17, %s485_s10 }
 0x3df   :  { %386 = vrot.lane.b32.xlu1 %v101_v15, %s485_s10 }
 0x457   :  { %v368_v49 = vpop.xlane.xlu1 %367 }
 0x45b   :  { %v383_v53 = vpop.permute.xlu1 %382 }
 0x45f   :  { %v387_v56 = vpop.permute.xlu1 %386 }
 0x4a3   :  { %v357_v45 = vpop.f32.mrb[4].mxu0 }
 0x4a4   :  { %v372_v46 = vmul.f32 %v370_v44, %v357_v45  ;;  %v450_v47 = vpop.f32.mrb[5].mxu0 }
 0x4a6   :  { %v373_v48 = vsel %vm264_vm3, %v372_v46, 0.0 }
 0x4a7   :  { %374 = vadd.xlane.f32.xlu0 %v373_v48 }
 0x534   :  { %v375_v50 = vpop.xlane.xlu0 %374 }
 0x535   :  { %v376_v51 = vadd.f32 %v375_v50, %v368_v49 }
 0x537   :  { %v377_v52 = vadd.f32 %v546_v12, %v376_v51 }
 0x539   :  { %379 = vrot.lane.b32.xlu0 %v377_v52, %s486_s11 }
 0x53d   :  { %389 = vrot.lane.b32.xlu0 %v286_v43, %s487_s12 }
 0x5ab   :  { %v380_v54 = vpop.permute.xlu0 %379 }
 0x5ac   :  { %v393_v55 = vsel %vm392_vm7, %v380_v54, %v383_v53 }
 0x5ad   :  { %v395_v57 = vsel %vm394_vm8, %v393_v55, %v387_v56 }
 0x5af   :  { %v390_v58 = vpop.permute.xlu0 %389 }
 0x5b0   :  { %v397_v59 = vsel %vm396_vm9, %v395_v57, %v390_v58 }
 0x5b1   :  { %v399_v60 = vsel %vm398_vm10, %v397_v59, 0.0 }
 0x5b2   :  { %400 = vst [vmem:[%s570_s5] sm:$0x3] %v399_v60 }

</bundles_post_ra>
